<compile_context>
chip_gen: v7x
topology: tpu7x:2x2x1
jax: 0.10.0
libtpu: 0.0.40
codegen_flags: <defaults>
</compile_context>

<pallas_src>
import jax
import jax.numpy as jnp
from jax import lax
from jax.experimental import pallas as pl
from jax.experimental.pallas import tpu as pltpu
import numpy as np

# ---------------- config (small synthetic shapes) ----------------
B, C_IN, H, W = 2, 3, 16, 16
S = H * W            # flattened spatial sequence length
D = 32               # hidden dim
Q = 8                # number of object queries
NUM_CLASSES = 8      # foreground classes; logits have NUM_CLASSES + 1 (no-object)
NH = NUM_CLASSES + 1 + 4   # fused head width: 9 class logits + 4 box params

# ---- parameter-slab row layout: one lane-dense (SLAB_ROWS, S) f32 slab, one DMA ----
R_W = 0              # rows [0, 2D)   : fused backbone weights (2D, C_IN+1), bias in col C_IN
R_POS = R_W + 2 * D  # rows [64, 96)  : transposed positional embedding (D, S)
R_Q = R_POS + D      # rows [96, 104) : pre-scaled object queries (Q, D)
R_WH = R_Q + Q       # rows [104,136) : fused class+box head weights (D, NH)
R_BH = R_WH + D      # row  136       : fused head bias (1, NH)
SLAB_ROWS = ((R_BH + 1 + 7) // 8) * 8   # 144 (sublane aligned)


# ---------------- fused kernel (one grid step = one image) ----------------
def _fused_detr_kernel(x_ref, slab_ref, size_ref, out_ref):
    # x_ref   : (1, C_IN+1, S)   lane-dense spatial, ones row appended (bias fold)
    # slab_ref: (SLAB_ROWS, S)   packed parameters (resident across grid steps)
    # size_ref: (B, 2) in SMEM   (img_w, img_h) per image
    # out_ref : (1, Q, 8)        packed [score, label, x1, y1, x2, y2, 0, 0]
    b = pl.program_id(0)

    # static ref-slices of the single parameter slab (zero-cost views)
    w_fused = slab_ref[R_W:R_W + 2 * D, 0:C_IN + 1]        # (2D, C_IN+1)
    pos_t = slab_ref[R_POS:R_POS + D, :]                   # (D, S)
    qe = slab_ref[R_Q:R_Q + Q, 0:D]                        # (Q, D), 1/sqrt(D) folded in
    wh = slab_ref[R_WH:R_WH + D, 0:NH]                     # (D, NH)
    bh = slab_ref[R_BH:R_BH + 1, 0:NH]                     # (1, NH)

    # --- early-summation backbone: ONE fused GEMM, split on sublanes, relu, sum ---
    x_aug = x_ref[0]                                       # (C_IN+1, S)
    hbb = jnp.dot(w_fused, x_aug, preferred_element_type=jnp.float32)    # (2D, S)
    mem_t = (jnp.maximum(hbb[0:D], 0.0)
             + jnp.maximum(hbb[D:2 * D], 0.0) + pos_t)     # (D, S) lane-dense

    # --- decoder cross-attention ---
    s = jnp.dot(qe, mem_t, preferred_element_type=jnp.float32)           # (Q, S), K=32
    m = jnp.max(s, axis=-1, keepdims=True)
    e = jnp.exp(s - m)
    p = e / jnp.sum(e, axis=-1, keepdims=True)
    mem = mem_t.T                          # one explicit (32,256) XLU transpose
    hs = jnp.dot(p, mem, preferred_element_type=jnp.float32)             # (Q, D), K=256

    # --- fused class + box heads (single GEMM) ---
    lb = jnp.dot(hs, wh, preferred_element_type=jnp.float32) + bh        # (Q, NH)

    # --- class softmax on the intact (Q, NH) tile with lane masks ---
    lane = lax.broadcasted_iota(jnp.int32, lb.shape, 1)
    cls_mask = lane < NUM_CLASSES + 1
    fg_mask = lane < NUM_CLASSES
    logits_m = jnp.where(cls_mask, lb, -jnp.inf)
    ml = jnp.max(logits_m, axis=-1, keepdims=True)
    el = jnp.exp(logits_m - ml)                            # box lanes -> 0
    prob = el / jnp.sum(el, axis=-1, keepdims=True)
    prob_fg = jnp.where(fg_mask, prob, -1.0)
    scores = jnp.max(prob_fg, axis=-1, keepdims=True)      # (Q, 1)
    labels = jnp.min(jnp.where(prob_fg == scores, lane, NH),
                     axis=-1, keepdims=True).astype(jnp.float32)         # (Q, 1)

    # --- boxes: sigmoid, cxcywh -> xyxy via VPU math, scale by (w, h, w, h) ---
    zb = lb[:, NUM_CLASSES + 1:NUM_CLASSES + 5]            # single lane slice (Q, 4)
    boxes = 1.0 / (1.0 + jnp.exp(-zb))
    cxcy = boxes[:, 0:2]
    whb = boxes[:, 2:4]
    xyxy = jnp.concatenate([cxcy - 0.5 * whb, cxcy + 0.5 * whb], axis=-1)  # (Q, 4)
    img_w = size_ref[b, 0]
    img_h = size_ref[b, 1]
    lane4 = lax.broadcasted_iota(jnp.int32, xyxy.shape, 1)
    xyxy = xyxy * jnp.where((lane4 & 1) == 0, img_w, img_h)

    # --- one packed lane-dense store per image ---
    packed = jnp.concatenate(
        [scores, labels, xyxy, jnp.zeros((Q, 2), jnp.float32)], axis=-1)   # (Q, 8)
    out_ref[0] = packed


# ---------------- host-side one-time param packing into one slab ----------------
def pack_params(params):
    w1t = jnp.asarray(params["w1"]).T                      # (D, C_IN)
    b1 = jnp.asarray(params["b1"]).reshape(D, 1)
    w2t = jnp.asarray(params["w2"]).T
    b2 = jnp.asarray(params["b2"]).reshape(D, 1)
    w_fused = jnp.concatenate(
        [jnp.concatenate([w1t, b1], 1), jnp.concatenate([w2t, b2], 1)], 0)  # (2D, C_IN+1)
    wh = jnp.concatenate([params["wc"], params["wb"]], 1)  # (D, NH)
    bh = jnp.concatenate([params["bc"], params["bb"]], 1)  # (1, NH)
    q_scaled = jnp.asarray(params["query_embed"]) * jnp.float32(1.0 / np.sqrt(D))

    slab = jnp.zeros((SLAB_ROWS, S), jnp.float32)
    slab = slab.at[R_W:R_W + 2 * D, 0:C_IN + 1].set(w_fused)
    slab = slab.at[R_POS:R_POS + D, :].set(jnp.asarray(params["pos"]).T)
    slab = slab.at[R_Q:R_Q + Q, 0:D].set(q_scaled)
    slab = slab.at[R_WH:R_WH + D, 0:NH].set(wh)
    slab = slab.at[R_BH:R_BH + 1, 0:NH].set(bh)
    return slab


# ---------------- full forward (EarlySummationDETRWrapper.forward) ----------------
def early_summation_detr_wrapper(param_slab, x, img_size):
    """x: [B, 3, H, W] (NCHW); img_size: [B, 2] = (imgWidth, imgHeight).
    Returns (scores[Q], labels[Q], boxes[Q,4]) for the FIRST image only."""
    b = x.shape[0]
    x3 = x.reshape(b, C_IN, H * W)                         # contiguous reshape
    x_aug = jnp.concatenate([x3, jnp.ones((b, 1, H * W), x3.dtype)], axis=1)
    out = pl.pallas_call(
        _fused_detr_kernel,
        out_shape=jax.ShapeDtypeStruct((b, Q, 8), jnp.float32),
        grid=(b,),
        in_specs=[
            pl.BlockSpec((1, C_IN + 1, S), lambda i: (i, 0, 0)),     # per-image input
            pl.BlockSpec((SLAB_ROWS, S), lambda i: (0, 0)),          # resident params
            pl.BlockSpec(memory_space=pltpu.MemorySpace.SMEM),       # img_size scalars
        ],
        out_specs=pl.BlockSpec((1, Q, 8), lambda i: (i, 0, 0)),
        compiler_params=pltpu.CompilerParams(
            dimension_semantics=("parallel",)),   # 2 TCs on v7x; live-range bound on v5e/v6e
    )(x_aug, param_slab, img_size)
    first = out[0]
    scores = first[:, 0]
    labels = first[:, 1].astype(jnp.int32)
    boxes = first[:, 2:6]
    return scores, labels, boxes
    # TODO(synk): torch.jit tracing / dict-output unpacking is host-side glue; omitted.


# ---------------- pure-JAX reference (correctness check) ----------------
_CVT = jnp.array([[1.0, 0.0, 1.0, 0.0],
                  [0.0, 1.0, 0.0, 1.0],
                  [-0.5, 0.0, 0.5, 0.0],
                  [0.0, -0.5, 0.0, 0.5]], jnp.float32)   # cxcywh -> xyxy


def _reference(params, x, img_size):
    b = x.shape[0]
    xf = jnp.transpose(x, (0, 2, 3, 1)).reshape(b * H * W, C_IN)
    feat = (jnp.maximum(xf @ params["w1"] + params["b1"], 0.0)
            + jnp.maximum(xf @ params["w2"] + params["b2"], 0.0))
    mem = feat.reshape(b, S, D) + params["pos"][None]
    s = jnp.einsum("qd,bsd->bqs", params["query_embed"], mem) / jnp.sqrt(jnp.float32(D))
    p = jax.nn.softmax(s, axis=-1)
    hs = jnp.einsum("bqs,bsd->bqd", p, mem).reshape(b * Q, D)
    logits = hs @ params["wc"] + params["bc"]
    boxes = jax.nn.sigmoid(hs @ params["wb"] + params["bb"])
    prob = jax.nn.softmax(logits, axis=-1)[:, :NUM_CLASSES]
    scores = prob.max(-1)
    labels = prob.argmax(-1).astype(jnp.int32)
    xyxy = boxes @ _CVT
    scale = jnp.concatenate([img_size, img_size], -1)
    scale_bq = jnp.broadcast_to(scale[:, None, :], (b, Q, 4)).reshape(b * Q, 4)
    xyxy = xyxy * scale_bq
    return scores.reshape(b, Q)[0], labels.reshape(b, Q)[0], xyxy.reshape(b, Q, 4)[0]


# ---------------- main ----------------
if __name__ == "__main__":
    key = jax.random.PRNGKey(0)
    ks = jax.random.split(key, 12)
    params = {
        "w1": jax.random.normal(ks[0], (C_IN, D), jnp.float32) * 0.2,
        "b1": jax.random.normal(ks[1], (1, D), jnp.float32) * 0.1,
        "w2": jax.random.normal(ks[2], (C_IN, D), jnp.float32) * 0.2,
        "b2": jax.random.normal(ks[3], (1, D), jnp.float32) * 0.1,
        "pos": jax.random.normal(ks[4], (S, D), jnp.float32) * 0.1,
        "query_embed": jax.random.normal(ks[5], (Q, D), jnp.float32) * 0.5,
        "wc": jax.random.normal(ks[6], (D, NUM_CLASSES + 1), jnp.float32) * 0.2,
        "bc": jax.random.normal(ks[7], (1, NUM_CLASSES + 1), jnp.float32) * 0.1,
        "wb": jax.random.normal(ks[8], (D, 4), jnp.float32) * 0.2,
        "bb": jax.random.normal(ks[9], (1, 4), jnp.float32) * 0.1,
    }
    x = jax.random.normal(ks[10], (B, C_IN, H, W), jnp.float32)
    img_size = jnp.array([[640.0, 480.0], [320.0, 240.0]], jnp.float32)  # (w, h)

    param_slab = jax.block_until_ready(pack_params(params))

    scores, labels, boxes = jax.block_until_ready(
        early_summation_detr_wrapper(param_slab, x, img_size))

    ref_scores, ref_labels, ref_boxes = _reference(params, x, img_size)
    np.testing.assert_allclose(np.asarray(scores), np.asarray(ref_scores),
                               rtol=1e-4, atol=1e-5)
    np.testing.assert_array_equal(np.asarray(labels), np.asarray(ref_labels))
    np.testing.assert_allclose(np.asarray(boxes), np.asarray(ref_boxes),
                               rtol=1e-4, atol=1e-3)
    assert scores.shape == (Q,) and labels.shape == (Q,) and boxes.shape == (Q, 4)
    print("KERNEL_OK")
</pallas_src>

<mosaic_0001>
module attributes {stable_mosaic.version = 11 : i64} {
  func.func @_fused_detr_kernel(%arg0: i32, %arg1: memref<1x4x256xf32, #tpu.memory_space<vmem>>, %arg2: memref<144x256xf32, #tpu.memory_space<vmem>>, %arg3: memref<2x2xf32, #tpu.memory_space<smem>>, %arg4: memref<1x8x8xf32, #tpu.memory_space<vmem>>) attributes {dimension_semantics = [#tpu.dimension_semantics<parallel>], iteration_bounds = array<i64: 2>, scalar_prefetch = 0 : i64, scratch_operands = 0 : i64, tpu.core_type = #tpu.core_type<tc>, window_params = [{transform_indices = @transform_0, window_bounds = array<i64: 1, 4, 256>}, {pipeline_mode = #tpu.pipeline_mode<synchronous>, transform_indices = @transform_1, window_bounds = array<i64: 144, 256>}, {transform_indices = @transform_2, window_bounds = array<i64: 2, 2>}, {transform_indices = @transform_3, window_bounds = array<i64: 1, 8, 8>}]} {
    %c0 = arith.constant 0 : index
    %c0_0 = arith.constant 0 : index
    %0 = vector.load %arg2[%c0, %c0_0] : memref<144x256xf32, #tpu.memory_space<vmem>>, vector<64x4xf32>
    %c64 = arith.constant 64 : index
    %c0_1 = arith.constant 0 : index
    %1 = vector.load %arg2[%c64, %c0_1] : memref<144x256xf32, #tpu.memory_space<vmem>>, vector<32x256xf32>
    %c96 = arith.constant 96 : index
    %c0_2 = arith.constant 0 : index
    %2 = vector.load %arg2[%c96, %c0_2] : memref<144x256xf32, #tpu.memory_space<vmem>>, vector<8x32xf32>
    %c104 = arith.constant 104 : index
    %c0_3 = arith.constant 0 : index
    %3 = vector.load %arg2[%c104, %c0_3] : memref<144x256xf32, #tpu.memory_space<vmem>>, vector<32x13xf32>
    %c136 = arith.constant 136 : index
    %c0_4 = arith.constant 0 : index
    %4 = vector.load %arg2[%c136, %c0_4] : memref<144x256xf32, #tpu.memory_space<vmem>>, vector<1x13xf32>
    %c0_5 = arith.constant 0 : index
    %c0_6 = arith.constant 0 : index
    %c0_7 = arith.constant 0 : index
    %5 = vector.load %arg1[%c0_5, %c0_6, %c0_7] : memref<1x4x256xf32, #tpu.memory_space<vmem>>, vector<1x4x256xf32>
    %6 = vector.shape_cast %5 : vector<1x4x256xf32> to vector<4x256xf32>
    %cst = arith.constant dense<0.000000e+00> : vector<64x256xf32>
    %7 = tpu.matmul %0, %6, %cst {dimension_numbers = #tpu.dot_dimension_numbers<[1], [0], [0], [1], [0, 0, 1, 1], [], []>} : vector<64x4xf32>, vector<4x256xf32>, vector<64x256xf32> -> vector<64x256xf32>
    %8 = vector.extract_strided_slice %7 {offsets = [0, 0], sizes = [32, 256], strides = [1, 1]} : vector<64x256xf32> to vector<32x256xf32>
    %cst_8 = arith.constant 0.000000e+00 : f32
    %9 = vector.broadcast %cst_8 : f32 to vector<32x256xf32>
    %10 = arith.maximumf %8, %9 : vector<32x256xf32>
    %11 = vector.extract_strided_slice %7 {offsets = [32, 0], sizes = [32, 256], strides = [1, 1]} : vector<64x256xf32> to vector<32x256xf32>
    %cst_9 = arith.constant 0.000000e+00 : f32
    %12 = vector.broadcast %cst_9 : f32 to vector<32x256xf32>
    %13 = arith.maximumf %11, %12 : vector<32x256xf32>
    %14 = arith.addf %10, %13 : vector<32x256xf32>
    %15 = arith.addf %14, %1 : vector<32x256xf32>
    %cst_10 = arith.constant dense<0.000000e+00> : vector<8x256xf32>
    %16 = tpu.matmul %2, %15, %cst_10 {dimension_numbers = #tpu.dot_dimension_numbers<[1], [0], [0], [1], [0, 0, 1, 1], [], []>} : vector<8x32xf32>, vector<32x256xf32>, vector<8x256xf32> -> vector<8x256xf32>
    %cst_11 = arith.constant dense<0xFF800000> : vector<8xf32>
    %17 = vector.multi_reduction <maximumf>, %16, %cst_11 [1] : vector<8x256xf32> to vector<8xf32>
    %18 = vector.shape_cast %17 : vector<8xf32> to vector<8x1xf32>
    %19 = vector.broadcast %18 : vector<8x1xf32> to vector<8x256xf32>
    %20 = arith.subf %16, %19 : vector<8x256xf32>
    %21 = math.exp %20 : vector<8x256xf32>
    %cst_12 = arith.constant dense<0.000000e+00> : vector<8xf32>
    %22 = vector.multi_reduction <add>, %21, %cst_12 [1] : vector<8x256xf32> to vector<8xf32>
    %23 = vector.shape_cast %22 : vector<8xf32> to vector<8x1xf32>
    %24 = vector.broadcast %23 : vector<8x1xf32> to vector<8x256xf32>
    %25 = arith.divf %21, %24 : vector<8x256xf32>
    %26 = tpu.transpose %15, [1, 0] : vector<32x256xf32> -> vector<256x32xf32>
    %cst_13 = arith.constant dense<0.000000e+00> : vector<8x32xf32>
    %27 = tpu.matmul %25, %26, %cst_13 {dimension_numbers = #tpu.dot_dimension_numbers<[1], [0], [0], [1], [0, 0, 1, 1], [], []>} : vector<8x256xf32>, vector<256x32xf32>, vector<8x32xf32> -> vector<8x32xf32>
    %cst_14 = arith.constant dense<0.000000e+00> : vector<8x13xf32>
    %28 = tpu.matmul %27, %3, %cst_14 {dimension_numbers = #tpu.dot_dimension_numbers<[1], [0], [0], [1], [0, 0, 1, 1], [], []>} : vector<8x32xf32>, vector<32x13xf32>, vector<8x13xf32> -> vector<8x13xf32>
    %29 = vector.broadcast %4 : vector<1x13xf32> to vector<8x13xf32>
    %30 = arith.addf %28, %29 : vector<8x13xf32>
    %31 = tpu.iota {dimensions = array<i32: 1>} : vector<8x13xi32>
    %c9_i32 = arith.constant 9 : i32
    %32 = vector.broadcast %c9_i32 : i32 to vector<8x13xi32>
    %33 = arith.cmpi slt, %31, %32 : vector<8x13xi32>
    %c8_i32 = arith.constant 8 : i32
    %34 = vector.broadcast %c8_i32 : i32 to vector<8x13xi32>
    %35 = arith.cmpi slt, %31, %34 : vector<8x13xi32>
    %cst_15 = arith.constant 0xFF800000 : f32
    %36 = vector.broadcast %cst_15 : f32 to vector<8x13xf32>
    %37 = arith.select %33, %30, %36 : vector<8x13xi1>, vector<8x13xf32>
    %cst_16 = arith.constant dense<0xFF800000> : vector<8xf32>
    %38 = vector.multi_reduction <maximumf>, %37, %cst_16 [1] : vector<8x13xf32> to vector<8xf32>
    %39 = vector.shape_cast %38 : vector<8xf32> to vector<8x1xf32>
    %40 = vector.broadcast %39 : vector<8x1xf32> to vector<8x13xf32>
    %41 = arith.subf %37, %40 : vector<8x13xf32>
    %42 = math.exp %41 : vector<8x13xf32>
    %cst_17 = arith.constant dense<0.000000e+00> : vector<8xf32>
    %43 = vector.multi_reduction <add>, %42, %cst_17 [1] : vector<8x13xf32> to vector<8xf32>
    %44 = vector.shape_cast %43 : vector<8xf32> to vector<8x1xf32>
    %45 = vector.broadcast %44 : vector<8x1xf32> to vector<8x13xf32>
    %46 = arith.divf %42, %45 : vector<8x13xf32>
    %cst_18 = arith.constant -1.000000e+00 : f32
    %47 = vector.broadcast %cst_18 : f32 to vector<8x13xf32>
    %48 = arith.select %35, %46, %47 : vector<8x13xi1>, vector<8x13xf32>
    %cst_19 = arith.constant dense<0xFF800000> : vector<8xf32>
    %49 = vector.multi_reduction <maximumf>, %48, %cst_19 [1] : vector<8x13xf32> to vector<8xf32>
    %50 = vector.shape_cast %49 : vector<8xf32> to vector<8x1xf32>
    %51 = vector.broadcast %50 : vector<8x1xf32> to vector<8x13xf32>
    %52 = arith.cmpf oeq, %48, %51 : vector<8x13xf32>
    %c13_i32 = arith.constant 13 : i32
    %53 = vector.broadcast %c13_i32 : i32 to vector<8x13xi32>
    %54 = arith.select %52, %31, %53 : vector<8x13xi1>, vector<8x13xi32>
    %cst_20 = arith.constant dense<2147483647> : vector<8xi32>
    %55 = vector.multi_reduction <minsi>, %54, %cst_20 [1] : vector<8x13xi32> to vector<8xi32>
    %56 = vector.shape_cast %55 : vector<8xi32> to vector<8x1xi32>
    %57 = arith.sitofp %56 : vector<8x1xi32> to vector<8x1xf32>
    %58 = vector.extract_strided_slice %30 {offsets = [0, 9], sizes = [8, 4], strides = [1, 1]} : vector<8x13xf32> to vector<8x4xf32>
    %cst_21 = arith.constant 0.000000e+00 : f32
    %59 = vector.broadcast %cst_21 : f32 to vector<8x4xf32>
    %60 = arith.subf %59, %58 : vector<8x4xf32>
    %61 = math.exp %60 : vector<8x4xf32>
    %cst_22 = arith.constant 1.000000e+00 : f32
    %62 = vector.broadcast %cst_22 : f32 to vector<8x4xf32>
    %63 = arith.addf %62, %61 : vector<8x4xf32>
    %cst_23 = arith.constant 1.000000e+00 : f32
    %64 = vector.broadcast %cst_23 : f32 to vector<8x4xf32>
    %65 = arith.divf %64, %63 : vector<8x4xf32>
    %66 = vector.extract_strided_slice %65 {offsets = [0, 0], sizes = [8, 2], strides = [1, 1]} : vector<8x4xf32> to vector<8x2xf32>
    %67 = vector.extract_strided_slice %65 {offsets = [0, 2], sizes = [8, 2], strides = [1, 1]} : vector<8x4xf32> to vector<8x2xf32>
    %cst_24 = arith.constant 5.000000e-01 : f32
    %68 = vector.broadcast %cst_24 : f32 to vector<8x2xf32>
    %69 = arith.mulf %68, %67 : vector<8x2xf32>
    %70 = arith.subf %66, %69 : vector<8x2xf32>
    %cst_25 = arith.constant 5.000000e-01 : f32
    %71 = vector.broadcast %cst_25 : f32 to vector<8x2xf32>
    %72 = arith.mulf %71, %67 : vector<8x2xf32>
    %73 = arith.addf %66, %72 : vector<8x2xf32>
    %74 = tpu.concatenate %70, %73 in 1 : vector<8x2xf32>, vector<8x2xf32> -> vector<8x4xf32>
    %75 = arith.index_cast %arg0 : i32 to index
    %c0_26 = arith.constant 0 : index
    %76 = memref.load %arg3[%75, %c0_26] : memref<2x2xf32, #tpu.memory_space<smem>>
    %77 = arith.index_cast %arg0 : i32 to index
    %c1 = arith.constant 1 : index
    %78 = memref.load %arg3[%77, %c1] : memref<2x2xf32, #tpu.memory_space<smem>>
    %79 = tpu.iota {dimensions = array<i32: 1>} : vector<8x4xi32>
    %c1_i32 = arith.constant 1 : i32
    %80 = vector.broadcast %c1_i32 : i32 to vector<8x4xi32>
    %81 = arith.andi %79, %80 : vector<8x4xi32>
    %c0_i32 = arith.constant 0 : i32
    %82 = vector.broadcast %c0_i32 : i32 to vector<8x4xi32>
    %83 = arith.cmpi eq, %81, %82 : vector<8x4xi32>
    %84 = vector.broadcast %76 : f32 to vector<8x4xf32>
    %85 = vector.broadcast %78 : f32 to vector<8x4xf32>
    %86 = arith.select %83, %84, %85 : vector<8x4xi1>, vector<8x4xf32>
    %87 = arith.mulf %74, %86 : vector<8x4xf32>
    %cst_27 = arith.constant 0.000000e+00 : f32
    %88 = vector.broadcast %cst_27 : f32 to vector<8x2xf32>
    %89 = tpu.concatenate %50, %57, %87, %88 in 1 : vector<8x1xf32>, vector<8x1xf32>, vector<8x4xf32>, vector<8x2xf32> -> vector<8x8xf32>
    %c0_28 = arith.constant 0 : index
    %c0_29 = arith.constant 0 : index
    %c0_30 = arith.constant 0 : index
    %90 = vector.load %arg4[%c0_28, %c0_29, %c0_30] : memref<1x8x8xf32, #tpu.memory_space<vmem>>, vector<1x8x8xf32>
    %91 = vector.shape_cast %90 : vector<1x8x8xf32> to vector<8x8xf32>
    %92 = vector.shape_cast %89 : vector<8x8xf32> to vector<1x8x8xf32>
    tpu.vector_store %arg4[%c0_28, %c0_29, %c0_30], %92 {strides = array<i32>} : memref<1x8x8xf32, #tpu.memory_space<vmem>>, vector<1x8x8xf32>,
    return
  }
  func.func @transform_0(%arg0: i32) -> (i32, i32, i32) {
    %c0_i32 = arith.constant 0 : i32
    %c0_i32_0 = arith.constant 0 : i32
    %c0_i32_1 = arith.constant 0 : i32
    return %arg0, %c0_i32, %c0_i32_0 : i32, i32, i32
  }
  func.func @transform_1(%arg0: i32) -> (i32, i32) {
    %c0_i32 = arith.constant 0 : i32
    %c0_i32_0 = arith.constant 0 : i32
    %c0_i32_1 = arith.constant 0 : i32
    return %c0_i32, %c0_i32_0 : i32, i32
  }
  func.func @transform_2(%arg0: i32) -> (i32, i32) {
    %c0_i32 = arith.constant 0 : i32
    %c0_i32_0 = arith.constant 0 : i32
    %c0_i32_1 = arith.constant 0 : i32
    return %c0_i32, %c0_i32_0 : i32, i32
  }
  func.func @transform_3(%arg0: i32) -> (i32, i32, i32) {
    %c0_i32 = arith.constant 0 : i32
    %c0_i32_0 = arith.constant 0 : i32
    %c0_i32_1 = arith.constant 0 : i32
    return %arg0, %c0_i32, %c0_i32_0 : i32, i32, i32
  }
}

</mosaic_0001>

<bundles_post_ra>
// kernel: tpu_custom_call.1
= control target key start
LH: loop header
LB: loop body
LE: loop exit
PB: predicated region body
PF: predicated region fallthrough
CT: control target
= control target key end

     0   :  { %8 = vsyncpa [#allocation3], 0  ;;  %s1429_s0 = inlined_call_operand.hbm [shape: f32[2,4,256], index: 0, kind: input, shape index: {}]   ;;  %s1430_s1 = inlined_call_operand.hbm [shape: f32[144,256], index: 1, kind: input, shape index: {}]   ;;  %s1431_s2 = inlined_call_operand.vmem [shape: f32[2,2], index: 2, kind: input, shape index: {}]   ;;  %s1432_s3 = inlined_call_operand.hbm [shape: f32[2,8,8], index: 3, kind: output, shape index: {}]  }
   0x1   :  { %10 = vsyncpa [#allocation3 + $0x1], 0 }
   0x2   :  { %11 = vsyncpa [#allocation7], 0 }
   0x3   :  { %12 = vsyncpa [#allocation5], 0 }
   0x4   :  { %13 = vsyncpa [#allocation4], 0 }
   0x5   :  { %15 = vsyncpa [#allocation4 + $0x1], 0  ;;  %s1180_s12 = smov 0   ;;  %s1182_s13 = smov 0  }
   0x6   :  { %s1184_s14 = smov 0   ;;  %s1186_s15 = smov 0  }
   0x7 LB: > { %s1201_s16 = sadd.s32 4294967295, %s1145_s15   ;;  %s838_s17 = sadd.s32 4294967294, %s1145_s15   ;;  %s1145_s15 = sphi %s1186_s15, %s1454_s15   ;;  %s1141_s14 = sphi %s1184_s14, %s1453_s14   ;;  %s1137_s13 = sphi %s1182_s13, %s1452_s13   ;;  %s1133_s12 = sphi %s1180_s12, %s1451_s12  }
   0x8   : > { %p41_p0 = scmp.ne.s32.totalorder %s1137_s13, %s1133_s12  ;;  %p1433_p1 = scmp.eq.s32.totalorder %s1201_s16, 0 }
   0x9   : > { %p113_p3 = scmp.eq.s32.totalorder %s838_s17, 1  ;;  %p839_p5 = scmp.ge.s32.totalorder %s1145_s15, 1 }
   0xa   : > { %p1210_p4 = por %p1433_p1, %p41_p0  ;;  %p120_p7 = scmp.lt.s32.totalorder %s1145_s15, 3 }
   0xb   : > { %p1215_p6 = por %p113_p3, %p41_p0  ;;  %s1147_s21 = smov [#allocation6]  }
   0xc   : > { %s1436_s18 = scalar_select %p1210_p4, 1, 0 }
   0xd   : > { %s1437_s19 = scalar_select %p1215_p6, 1, 0 }
   0xe   : > { %p1220_p8 = pnand %p839_p5, %p120_p7  ;;  %s132_s22 = sshll.u32 %s1147_s21, 4  ;;  %s133_s22 = int_to_ptr.vmem [resolvable:$true] %s132_s22 }
   0xf   : > { %s146_s25 = sshll.u32 %s1431_s2, 4  ;;  %s998_s29 = scalar_lea.hbm %s1430_s1, 4608  ;;  %s1236_s25 = int_to_ptr.vmem [resolvable:$true] %s146_s25 }
  0x10   : > { %s1438_s20 = scalar_select %p1220_p8, 1, 0 }
  0x11   : > { %p919_p9 = pneg %p1220_p8  ;;  %p999_p12 = scmp.ne.s32.totalorder %s1430_s1, %s998_s29 }
  0x12   : > { %p1005_p5 = scmp.lt.u32.totalorder %s998_s29, %s1430_s1 }
  0x13   : > { %p1232_p11 = pnand %p919_p9, %p1433_p1 }
  0x15   : > { %p1000_p13 = pneg %p1232_p11 }
  0x17   : > { %p1001_p0 = pnand %p1000_p13, %p999_p12 }
  0x19   : > { %p1002_p3 = pneg %p1001_p0 }
  0x1b   : > { %p1007_p7 = pnand %p1005_p5, %p1002_p3 }
  0x1d   : > { %1010 = shalt.err (!%p1007_p7)
}
  0x1e   : > { %s1011_s7 = scalar_lea.vmem %s133_s22, 4608  ;;  %p1019_p2 = scmp.lt.s32.totalorder %s133_s22, %s133_s22 }
  0x1f   : > { %p1012_p9 = scmp.ne.s32.totalorder %s133_s22, %s1011_s7  ;;  %p1020_p6 = scmp.lt.s32.totalorder %s1011_s7, %s1011_s7 }
  0x21   : > { %p1014_p10 = pnand %p1012_p9, %p1000_p13  ;;  %p1021_p4 = por %p1020_p6, %p1019_p2 }
  0x23   : > { %p1015_p1 = pneg %p1014_p10 }
  0x25   : > { %p1022_p8 = pnand %p1021_p4, %p1015_p1 }
  0x27   : > { %1025 = shalt.err (!%p1022_p8)
}
  0x28   : > { %s1148_s8 = smov 256   ;;  %s1149_s9 = smov 16  }
  0x29   : > { %922 = dma.hbm_to_vmem [thread:$0]  (!%p1232_p11), %s1430_s1, 4608, %s133_s22, [#allocation7], %s1148_s8, %s1148_s8, %s1149_s9  }
  0x2a   : > { %s1026_s17 = scalar_lea.vmem %s1236_s25, 32  ;;  %p1034_p1 = scmp.lt.s32.totalorder %s1236_s25, %s1236_s25 }
  0x2b   : > { %p1027_p12 = scmp.ne.s32.totalorder %s1236_s25, %s1026_s17  ;;  %p1035_p4 = scmp.lt.s32.totalorder %s1026_s17, %s1026_s17 }
  0x2d   : > { %p1029_p10 = pnand %p1027_p12, %p1000_p13  ;;  %p1036_p6 = por %p1035_p4, %p1034_p1 }
  0x2f   : > { %p1030_p2 = pneg %p1029_p10 }
  0x31   : > { %p1037_p8 = pnand %p1036_p6, %p1030_p2 }
  0x33   : > { %1040 = shalt.err (!%p1037_p8)
}
  0x34   : > { %s1150_s21 = smov [#allocation8]   ;;  %s1271_s22 = sadd.s32 1, %s1145_s15  }
  0x35   : > { %925 = dma.vmem_to_smem (!%p1232_p11), %s1236_s25, 32, %s1150_s21, [#allocation5]  }
  0x36   : > { %s28_s23 = sadd.s32 1, %s1141_s14  ;;  %s25_s24 = ssub.s32 %s1145_s15, %s1271_s22 }
  0x37   : > { %p35_p13 = scmp.ne.s32.totalorder %s1141_s14, %s1137_s13  ;;  %p26_p0 = scmp.eq.s32.totalorder %s25_s24, 0 }
  0x38   : > { %p36_p3 = scmp.eq.s32.totalorder %s1145_s15, 0  ;;  %p1440_p5 = scmp.eq.s32.totalorder %s1201_s16, 1 }
  0x39   : > { %p936_p9 = scmp.lt.s32.totalorder %s1145_s15, 2  ;;  %s157_s28 = sand.u32 1, %s1141_s14  }
  0x3a   : > { %p1281_p7 = por %p1440_p5, %p35_p13  ;;  %p37_p12 = por %p36_p3, %p35_p13 }
  0x3b   : > { %s1287_s27 = scalar_select %p26_p0, %s1141_s14, %s28_s23  }
  0x3c   : > { %s843_s29 = sshll.u32 %s157_s28, 3  ;;  %s868_s25 = sshll.u32 %s1145_s15, 7 }
  0x3d   : > { %s1294_s5 = scalar_lea.hbm %s1429_s0, %s868_s25  ;;  %s161_s6 = scalar_lea.vmem [#allocation2], %s843_s29 }
  0x3e   : > { %s169_s7 = sshll.u32 %s161_s6, 4  ;;  %p1298_p11 = pnand %p936_p9, %p37_p12  ;;  %s1296_s7 = int_to_ptr.vmem [resolvable:$true] %s169_s7 }
  0x3f   : > { %s158_s9 = scalar_lea.sflag [#allocation3], %s157_s28  ;;  %s1041_s10 = scalar_lea.hbm %s1294_s5, 128 }
  0x40   : > { %p1042_p10 = scmp.ne.s32.totalorder %s1294_s5, %s1041_s10  ;;  %p1043_p2 = pneg %p1298_p11 }
  0x41   : > { %s1046_s21 = scalar_lea.hbm %s1429_s0, 256  ;;  %p1047_p6 = scmp.lt.u32.totalorder %s1294_s5, %s1429_s0 }
  0x42   : > { %p1044_p1 = pnand %p1043_p2, %p1042_p10  ;;  %p1048_p8 = scmp.lt.u32.totalorder %s1046_s21, %s1041_s10 }
  0x43   : > { %p1050_p0 = scmp.lt.u32.totalorder %s1041_s10, %s1294_s5 }
  0x44   : > { %p1045_p4 = pneg %p1044_p1  ;;  %p1049_p13 = por %p1048_p8, %p1047_p6 }
  0x46   : > { %p1051_p3 = por %p1050_p0, %p1049_p13 }
  0x48   : > { %p1052_p5 = pnand %p1051_p3, %p1045_p4 }
  0x4a   : > { %1055 = shalt.err (!%p1052_p5)
}
  0x4b   : > { %s1056_s28 = scalar_lea.vmem %s1296_s7, 128  ;;  %s1151_s29 = smov [#allocation2]  }
  0x4c   : > { %p1057_p9 = scmp.ne.s32.totalorder %s1296_s7, %s1056_s28  ;;  %s1061_s25 = sshll.u32 %s1151_s29, 4  ;;  %s1062_s25 = int_to_ptr.vmem [resolvable:$false] %s1061_s25 }
  0x4d   : > { %s1063_s30 = scalar_lea.vmem %s1062_s25, 256  ;;  %p1064_p1 = scmp.lt.s32.totalorder %s1296_s7, %s1062_s25 }
  0x4e   : > { %p1059_p12 = pnand %p1057_p9, %p1043_p2  ;;  %p1065_p6 = scmp.lt.s32.totalorder %s1063_s30, %s1056_s28 }
  0x50   : > { %p1060_p10 = pneg %p1059_p12  ;;  %p1066_p8 = por %p1065_p6, %p1064_p1 }
  0x52   : > { %p1067_p13 = pnand %p1066_p8, %p1060_p10 }
  0x54   : > { %1070 = shalt.err (!%p1067_p13)
}
  0x55   : > { %929 = dma.hbm_to_vmem [thread:$0]  (!%p1298_p11), %s1294_s5, 128, %s1296_s7, %s158_s9  }
  0x56   : > { %p1443_p4 = scmp.ne.s32.totalorder %s1438_s20, 0 }
  0x57   : > { %s1330_s4 = sand.u32 (!%p1443_p4), 1, %s1137_s13   ;;  %p1444_p2 = scmp.ne.s32.totalorder (!%p1443_p4), %s1436_s18, 0 }
  0x58   : > { %178 = sbr.rel (%p1443_p4) target bundleno = 2095 (0x82f), region = 32  ;;  %s847_s6 = sshll.u32 (!%p1443_p4), %s1330_s4, 3 }
  0x59   : > { %s181_s10 = scalar_lea.sflag (!%p1443_p4), [#allocation3], %s1330_s4  ;;  %s184_s11 = scalar_lea.vmem (!%p1443_p4), [#allocation2], %s847_s6 }
  0x5f   : > { %1116 = dma.done.wait (%p1444_p2), %s181_s10, 128  }
  0x60   : > { %1118 = vsyncadd (%p1444_p2), %s181_s10, 4294967168  ;;  %p1445_p11 = scmp.eq.s32.totalorder %s1201_s16, 0 }
  0x62   : > { %1120 = dma.done.wait (%p1445_p11), [#allocation7], 4608   ;;  %p1446_p0 = pmov %p1445_p11 }
  0x64   : > { %1122 = vsyncadd (%p1446_p0), [#allocation7], 4294962688  ;;  %p1447_p3 = pmov %p1446_p0 }
  0x65   : > { %p1448_p5 = pmov %p1446_p0 }
  0x66   : > { %1124 = dma.done.wait (%p1447_p3), [#allocation5], 32  }
  0x67   : > { %1126 = vsyncadd (%p1448_p5), [#allocation5], 4294967264 }
  0x68   : > { %197 = sfence }
  0x69   : > { %v238_v0 = vld [vmem:[%s184_s11] sm:$0xff]  ;;  %vm266_vm0 = vcmask 1043456   ;;  %v1152_v2 = vmov 0.0   ;;  %v216_v3 = vld [vmem:[#allocation6] sm:$0xff]  ;;  %vm241_vm1 = vcmask 31744   ;;  %v225_v36 = vld [vmem:[#allocation6 + $0x88] sm:$0xff] }
  0x6a   : > { %v240_v1 = vcombine.high %v238_v0, %v238_v0  ;;  %335 = vmatprep.mubr.f32.mxu0 %v1152_v2  ;;  %484 = vmatprep.mubr.f32.mxu1 %v1152_v2  ;;  %v217_v4 = vld [vmem:[#allocation6 + $0x10] sm:$0xff]  ;;  %v218_v5 = vld [vmem:[#allocation6 + $0x20] sm:$0xff]  ;;  %v227_v37 = vld [vmem:[#allocation6 + $0x98] sm:$0xff]  ;;  %vm416_vm2 = vcmask 261120   ;;  %vm1154_vm3 = vmmov 0   ;;  %vm654_vm5 = vcmask 105472  }
  0x6b   : > { %v219_v6 = vld [vmem:[#allocation6 + $0x30] sm:$0xff]  ;;  %v220_v7 = vld [vmem:[#allocation6 + $0x40] sm:$0xff]  ;;  %v229_v61 = vld [vmem:[#allocation6 + $0xa8] sm:$0xff]  ;;  %s1155_s18 = smov 126   ;;  %s1156_s20 = smov 121   ;;  %vm709_vm10 = vcmask 15360  }
  0x6c   : > { %851 = vmatprep.subr.msk.mxu0 %vm266_vm0, %v240_v1  ;;  %v221_v8 = vld [vmem:[#allocation6 + $0x50] sm:$0xff]  ;;  %v222_v9 = vld [vmem:[#allocation6 + $0x60] sm:$0xff]  ;;  %v231_v63 = vld [vmem:[#allocation6 + $0xb8] sm:$0xff]  ;;  %s1157_s5 = smov 119   ;;  %s1373_s7 = sshll.u32 %s1201_s16, 7  ;;  %vm725_vm11 = vcmask 7168  }
  0x6d   : > { %852 = vmatpush1.msk.msra.mxu0 %vm266_vm0, %v238_v0  ;;  %v223_v10 = vld [vmem:[#allocation6 + $0x70] sm:$0xff]  ;;  %v224_v33 = vld [vmem:[#allocation6 + $0x80] sm:$0xff]  ;;  %s713_s8 = sadd.s32 1, %s1373_s7  ;;  %s712_s9 = sld [smem:[#allocation8 + %s1373_s7]]  ;;  %vm728_vm12 = vcmask 48128   ;;  %vm730_vm13 = vcmask 64512  }
  0x6e   : > { %853 = vmatmul.mubr.msk.f32.vlgmr.msra.gmra.mrb[0].mxu0 %vm241_vm1, %v216_v3  ;;  %v226_v34 = vld [vmem:[#allocation6 + $0x90] sm:$0xff]  ;;  %v228_v58 = vld [vmem:[#allocation6 + $0xa0] sm:$0xff]  ;;  %s714_s17 = sld [smem:[#allocation8 + %s713_s8]]  ;;  %s1158_s16 = smov 2  }
  0x6f   : > { %341 = vmatprep.mubr.f32.mxu0 %v1152_v2  ;;  %v230_v59 = vld [vmem:[#allocation6 + $0xb0] sm:$0xff]  ;;  %s215_s21 = scalar_lea.vmem [#allocation9], %s847_s6  ;;  %s1385_s29 = scalar_lea.hbm %s1432_s3, %s1373_s7 }
  0x70   : > { %s746_s23 = sshll.u32 %s215_s21, 4  ;;  %s733_s25 = scalar_lea.sflag [#allocation4], %s1330_s4  ;;  %s1387_s23 = int_to_ptr.vmem [resolvable:$true] %s746_s23 }
  0x71   : > { %s1071_s30 = scalar_lea.vmem %s1387_s23, 128  ;;  %s1159_s6 = smov [#allocation9]  }
  0x72   : > { %854 = vmatmul.mubr.msk.f32.gmra.mrb[2].mxu0 %vm241_vm1, %v217_v4  ;;  %p1072_p9 = scmp.ne.s32.totalorder %s1387_s23, %s1071_s30  ;;  %s1075_s10 = sshll.u32 %s1159_s6, 4  ;;  %s1076_s10 = int_to_ptr.vmem [resolvable:$false] %s1075_s10 }
  0x73   : > { %347 = vmatprep.mubr.f32.mxu0 %v1152_v2  ;;  %s1077_s11 = scalar_lea.vmem %s1076_s10, 256  ;;  %p1078_p1 = scmp.lt.s32.totalorder %s1387_s23, %s1076_s10 }
  0x74   : > { %p1073_p12 = pnand %p1072_p9, %p1281_p7  ;;  %p1079_p6 = scmp.lt.s32.totalorder %s1077_s11, %s1071_s30 }
  0x76   : > { %855 = vmatmul.mubr.msk.f32.gmra.mrb[4].mxu0 %vm241_vm1, %v218_v5  ;;  %p1074_p10 = pneg %p1073_p12  ;;  %p1080_p8 = por %p1079_p6, %p1078_p1 }
  0x77   : > { %353 = vmatprep.mubr.f32.mxu0 %v1152_v2 }
  0x78   : > { %p1081_p13 = pnand %p1080_p8, %p1074_p10 }
  0x7a   : > { %856 = vmatmul.mubr.msk.f32.gmra.mrb[6].mxu0 %vm241_vm1, %v219_v6 }
  0x7b   : > { %359 = vmatprep.mubr.f32.mxu0 %v1152_v2 }
  0x7e   : > { %857 = vmatmul.mubr.msk.f32.gmra.mrb[8].mxu0 %vm241_vm1, %v220_v7 }
  0x7f   : > { %365 = vmatprep.mubr.f32.mxu0 %v1152_v2 }
  0x82   : > { %858 = vmatmul.mubr.msk.f32.gmra.mrb[10].mxu0 %vm241_vm1, %v221_v8  ;;  %v232_v8 = vld [vmem:[#allocation6 + $0xc0] sm:$0xff] }
  0x83   : > { %371 = vmatprep.mubr.f32.mxu0 %v1152_v2 }
  0x86   : > { %859 = vmatmul.mubr.msk.f32.gmra.mrb[12].mxu0 %vm241_vm1, %v222_v9 }
  0x87   : > { %377 = vmatprep.mubr.f32.mxu0 %v1152_v2 }
  0x8a   : > { %860 = vmatmul.mubr.msk.f32.gmra.mrb[14].mxu0 %vm241_vm1, %v223_v10 }
 0x141   : > { %v337_v11 = vpop.f32.mrb[0].mxu0 }
 0x142   : > { %v339_v12 = vpop.f32.mrb[1].mxu0  ;;  %v384_v20 = vmax.f32 %v337_v11, 0.0 }
 0x143   : > { %v385_v23 = vmax.f32 %v339_v12, 0.0 }
 0x145   : > { %v343_v13 = vpop.f32.mrb[2].mxu0 }
 0x146   : > { %v345_v14 = vpop.f32.mrb[3].mxu0  ;;  %v386_v28 = vmax.f32 %v343_v13, 0.0 }
 0x147   : > { %v387_v31 = vmax.f32 %v345_v14, 0.0 }
 0x149   : > { %v349_v15 = vpop.f32.mrb[4].mxu0 }
 0x14a   : > { %v351_v16 = vpop.f32.mrb[5].mxu0  ;;  %v388_v40 = vmax.f32 %v349_v15, 0.0 }
 0x14b   : > { %v389_v45 = vmax.f32 %v351_v16, 0.0 }
 0x14d   : > { %v355_v17 = vpop.f32.mrb[6].mxu0 }
 0x14e   : > { %v357_v18 = vpop.f32.mrb[7].mxu0  ;;  %v390_v54 = vmax.f32 %v355_v17, 0.0 }
 0x14f   : > { %v391_v57 = vmax.f32 %v357_v18, 0.0 }
 0x151   : > { %v361_v19 = vpop.f32.mrb[8].mxu0 }
 0x152   : > { %v392_v21 = vmax.f32 %v361_v19, 0.0  ;;  %v363_v22 = vpop.f32.mrb[9].mxu0 }
 0x153   : > { %v393_v24 = vmax.f32 %v363_v22, 0.0  ;;  %v233_v22 = vld [vmem:[#allocation6 + $0xd0] sm:$0xff] }
 0x154   : > { %v400_v25 = vadd.f32 %v392_v21, %v384_v20  ;;  %v1153_v20 = vmov 0.0|0.0  }
 0x155   : > { %v401_v26 = vadd.f32 %v393_v24, %v385_v23  ;;  %v367_v27 = vpop.f32.mrb[10].mxu0  ;;  %v234_v23 = vld [vmem:[#allocation6 + $0xe0] sm:$0xff] }
 0x156   : > { %v394_v29 = vmax.f32 %v367_v27, 0.0  ;;  %v369_v30 = vpop.f32.mrb[11].mxu0  ;;  %v408_v43 = vadd.f32 %v400_v25, %v224_v33  ;;  %v902_v27 = vpack.c.bf16 %v234_v23, %v233_v22  ;;  %v649_v33 = vlaneseq }
 0x157   : > { %v395_v32 = vmax.f32 %v369_v30, 0.0  ;;  %v409_v47 = vadd.f32 %v401_v26, %v225_v36 }
 0x158   : > { %v402_v35 = vadd.f32 %v394_v29, %v386_v28  ;;  %v235_v28 = vld [vmem:[#allocation6 + $0xf0] sm:$0xff]  ;;  %v236_v29 = vld [vmem:[#allocation6 + $0x100] sm:$0xff] }
 0x159   : > { %v403_v38 = vadd.f32 %v395_v32, %v387_v31  ;;  %v373_v39 = vpop.f32.mrb[12].mxu0  ;;  %v905_v30 = vpack.c.bf16 %v236_v29, %v235_v28 }
 0x15a   : > { %v396_v41 = vmax.f32 %v373_v39, 0.0  ;;  %v375_v42 = vpop.f32.mrb[13].mxu0  ;;  %v410_v44 = vadd.f32 %v402_v35, %v226_v34  ;;  %v650_v34 = vand.u32 127, %v649_v33  ;;  %v237_v35 = vld [vmem:[#allocation6 + $0x110] ss:$0 sm:$0xff] }
 0x15b   : > { %v397_v46 = vmax.f32 %v375_v42, 0.0  ;;  %v411_v48 = vadd.f32 %v403_v38, %v227_v37 }
 0x15c   : > { %v404_v49 = vadd.f32 %v396_v41, %v388_v40  ;;  %v887_v50 = vpack.c.bf16 %v410_v44, %v408_v43  ;;  %vm651_vm4 = vcmp.lt.s32.totalorder %v650_v34, 9  ;;  %vm652_vm6 = vcmp.lt.s32.totalorder %v650_v34, 8 }
 0x15d   : > { %v405_v51 = vadd.f32 %v397_v46, %v389_v45  ;;  %v379_v52 = vpop.f32.mrb[14].mxu0  ;;  %v885_v53 = vpack.c.bf16 %v411_v48, %v409_v47 }
 0x15e   : > { %v398_v55 = vmax.f32 %v379_v52, 0.0  ;;  %v381_v56 = vpop.f32.mrb[15].mxu0  ;;  %v412_v1 = vadd.f32 %v404_v49, %v228_v58 }
 0x15f   : > { %v399_v60 = vmax.f32 %v381_v56, 0.0  ;;  %886 = vmatprep.subr.bf16.mxu1 %v885_v53  ;;  %v413_v4 = vadd.f32 %v405_v51, %v229_v61 }
 0x160   : > { %v406_v62 = vadd.f32 %v398_v55, %v390_v54  ;;  %888 = vmatpush1.bf16.msra.mxu1 %v887_v50 }
 0x161   : > { %v407_v0 = vadd.f32 %v399_v60, %v391_v57 }
 0x162   : > { %v414_v3 = vadd.f32 %v406_v62, %v230_v59 }
 0x163   : > { %v415_v5 = vadd.f32 %v407_v0, %v231_v63 }
 0x164   : > { %v891_v6 = vpack.c.bf16 %v414_v3, %v412_v1  ;;  %v715_v1 = vand.u32 1, %v650_v34 }
 0x165   : > { %v889_v7 = vpack.c.bf16 %v415_v5, %v413_v4  ;;  %v717_v5 = vstv %s712_s9 }
 0x166   : > { %vm716_vm8 = vcmp.eq.s32.totalorder %v715_v1, 0 }
 0x167   : > { %890 = vmatprep.subr.bf16.mxu1 %v889_v7 }
 0x168   : > { %892 = vmatpush1.bf16.msra.mxu1 %v891_v6 }
 0x169   : > { %894 = vmatprep.subr.bf16.mxu1 %v885_v53 }
 0x16b   : > { %861 = vmatmul.mubr.msk.f32.vlgmr.msra.gmra.mrb[0].mxu1 %vm416_vm2, %v232_v8 }
 0x171   : > { %896 = vmatpush1.bf16.xpose.msra.mxu1 %v887_v50 }
 0x172   : > { %898 = vmatprep.subr.bf16.mxu1 %v889_v7 }
 0x179   : > { %900 = vmatpush1.bf16.xpose.msra.mxu1 %v891_v6  ;;  %v718_v6 = vstv %s714_s17 }
 0x17a   : > { %901 = vmatprep.subr.bf16.mxu1 %v1153_v20  ;;  %v719_v8 = vsel %vm716_vm8, %v717_v5, %v718_v6 }
 0x23e   : > { %v486_v9 = vpop.f32.mrb[0].mxu1 }
 0x23f   : > { %v488_v10 = vpop.f32.mrb[1].mxu1 }
 0x240   : > { %v491_v11 = vmax.f32 %v486_v9, %v488_v10 }
 0x242   : > { %492 = vmax.xlane.f32.xlu0 %v491_v11 }
 0x2cf   : > { %v493_v12 = vpop.xlane.xlu0 %492 }
 0x2d0   : > { %v494_v13 = vsub.f32 %v486_v9, %v493_v12  ;;  %v495_v14 = vsub.f32 %v488_v10, %v493_v12 }
 0x2d2   : > { %v496_v15 = vmul.f32 1.442695, %v494_v13  ;;  %v498_v16 = vmul.f32 1.442695, %v495_v14 }
 0x2d4   : > { %984 = vpow2.f32 %v496_v15 }
 0x2d5   : > { %986 = vpow2.f32 %v498_v16 }
 0x2de   : > { %v985_v17 = vpop.eup %984 }
 0x2df   : > { %v987_v18 = vpop.eup %986 }
 0x2e0   : > { %v500_v19 = vadd.f32 %v987_v18, %v985_v17 }
 0x2e2   : > { %501 = vadd.xlane.f32.xlu0 %v500_v19 }
 0x36f   : > { %v502_v21 = vpop.xlane.xlu0 %501 }
 0x370   : > { %988 = vrcp.f32 %v502_v21 }
 0x37a   : > { %v989_v24 = vpop.eup %988 }
 0x37b   : > { %v505_v25 = vmul.f32 %v989_v24, %v987_v18  ;;  %v504_v26 = vmul.f32 %v989_v24, %v985_v17 }
 0x37d   : > { %570 = vmatprep.mubr.f32.mxu1 %v505_v25 }
 0x37e   : > { %571 = vmatmul.mubr.f32.vlgmr.msra.gmra.mrb[2].mxu1 %v504_v26 }
 0x37f   : > { %903 = vmatpush3.bf16.msra.mxu1 %v902_v27  ;;  %882 = vmatprep.mubr.msk.f32.mxu1 %vm1154_vm3, %v1152_v2 }
 0x380   : > { %904 = vmatprep.subr.bf16.mxu1 %v1153_v20 }
 0x383   : > { %906 = vmatpush3.bf16.msra.mxu1 %v905_v30 }
 0x451   : > { %v572_v31 = vpop.f32.mrb[2].mxu1 }
 0x452   : > { %v574_v32 = vpop.f32.mrb[3].mxu1  ;;  %883 = vmatmul.mubr.msk.f32.vlgmr.msra.gmra.mrb[4].mxu1 %vm416_vm2, %v572_v31 }
 0x525   : > { %v645_v36 = vpop.f32.mrb[4].mxu1 }
 0x526   : > { %v646_v37 = vadd.f32 %v645_v36, %v237_v35  ;;  %v884_v38 = vpop.f32.mrb[5].mxu1 }
 0x528   : > { %v653_v39 = vsel %vm651_vm4, %v646_v37, -inf  ;;  %v688_v41 = vsub.f32 0.0, %v646_v37 }
 0x529   : > { %v655_v40 = vsel %vm654_vm5, %v653_v39, -inf }
 0x52a   : > { %656 = vmax.xlane.f32.xlu1 %v655_v40  ;;  %v689_v42 = vmul.f32 1.442695, %v688_v41 }
 0x52c   : > { %990 = vpow2.f32 %v689_v42 }
 0x536   : > { %v991_v45 = vpop.eup %990 }
 0x537   : > { %v691_v47 = vadd.f32 1.0, %v991_v45 }
 0x5b7   : > { %v657_v43 = vpop.xlane.xlu1 %656 }
 0x5b8   : > { %v658_v2 = vsub.f32 %v653_v39, %v657_v43 }
 0x5ba   : > { %v659_v44 = vmul.f32 1.442695, %v658_v2 }
 0x5bc   : > { %992 = vpow2.f32 %v659_v44 }
 0x5bd   : > { %994 = vrcp.f32 %v691_v47 }
 0x5c6   : > { %v993_v46 = vpop.eup %992 }
 0x5c7   : > { %v661_v48 = vsel %vm654_vm5, %v993_v46, 0.0  ;;  %v995_v49 = vpop.eup %994 }
 0x5c8   : > { %662 = vadd.xlane.f32.xlu1 %v661_v48  ;;  %v694_v50 = vmul.f32 0.5, %v995_v49 }
 0x5d9   : > { %696 = vrot.lane.b32.xlu1 %v694_v50, %s1155_s18 }
 0x655   : > { %v663_v51 = vpop.xlane.xlu1 %662 }
 0x656   : > { %996 = vrcp.f32 %v663_v51 }
 0x659   : > { %v697_v52 = vpop.permute.xlu1 %696 }
 0x65a   : > { %v700_v53 = vadd.f32 %v995_v49, %v697_v52  ;;  %v699_v63 = vsub.f32 %v995_v49, %v697_v52 }
 0x65c   : > { %706 = vrot.lane.b32.xlu1 %v700_v53, %s1156_s20 }
 0x660   : > { %v997_v54 = vpop.eup %996 }
 0x661   : > { %v665_v55 = vmul.f32 %v997_v54, %v993_v46 }
 0x663   : > { %v666_v56 = vsel %vm652_vm6, %v665_v55, -1.0 }
 0x664   : > { %v667_v57 = vsel %vm654_vm5, %v666_v56, -inf }
 0x665   : > { %668 = vmax.xlane.f32.xlu0 %v667_v57 }
 0x6ce   : > { %v707_v9 = vpop.permute.xlu1 %706 }
 0x6f2   : > { %v669_v58 = vpop.xlane.xlu0 %668 }
 0x6f3   : > { %vm670_vm7 = vcmp.eq.f32.partialorder %v666_v56, %v669_v58 }
 0x6f4   : > { %v671_v59 = vsel %vm670_vm7, %v650_v34, 13 }
 0x6f5   : > { %v672_v60 = vsel %vm654_vm5, %v671_v59, 2147483647 }
 0x6f6   : > { %v674_v61 = vshra.s32 %v672_v60, 16  ;;  %v673_v0 = vand.u32 65535, %v672_v60 }
 0x6f8   : > { %v676_v62 = vcvt.s32.f32 %v674_v61  ;;  %v675_v4 = vcvt.s32.f32 %v673_v0 }
 0x6fa   : > { %677 = vmin.xlane.f32.xlu0 %v676_v62 }
 0x710   : > { %702 = vrot.lane.b32.xlu0 %v699_v63, %s1157_s5 }
 0x787   : > { %v678_v3 = vpop.xlane.xlu0 %677 }
 0x788   : > { %vm679_vm9 = vcmp.eq.f32.partialorder %v676_v62, %v678_v3  ;;  %v684_v13 = vcvt.f32.s32 %v678_v3 }
 0x789   : > { %v680_v7 = vsel %vm679_vm9, %v675_v4, inf }
 0x78a   : > { %681 = vmin.xlane.f32.xlu1 %v680_v7  ;;  %v685_v15 = vshll.u32 %v684_v13, 16 }
 0x78b   : > { %v703_v10 = vpop.permute.xlu0 %702 }
 0x78c   : > { %v710_v11 = vsel %vm709_vm10, %v703_v10, %v707_v9 }
 0x78d   : > { %v720_v12 = vmul.f32 %v719_v8, %v710_v11 }
 0x78f   : > { %722 = vrot.lane.b32.xlu0 %v720_v12, %s1158_s16 }
 0x801   : > { %v723_v19 = vpop.permute.xlu0 %722 }
 0x817   : > { %v682_v14 = vpop.xlane.xlu1 %681 }
 0x818   : > { %v683_v16 = vcvt.f32.s32 %v682_v14 }
 0x81a   : > { %v686_v17 = vadd.s32 %v685_v15, %v683_v16 }
 0x81c   : > { %v687_v18 = vcvt.s32.f32 %v686_v17 }
 0x81e   : > { %v726_v20 = vsel %vm725_vm11, %v669_v58, %v687_v18 }
 0x81f   : > { %v727_v21 = vsel %vm709_vm10, %v726_v20, %v723_v19 }
 0x820   : > { %v729_v22 = vsel %vm728_vm12, %v727_v21, 0.0 }
 0x821   : > { %731 = vst.msk [vmem:[%s215_s21] sm:$0xff] %vm730_vm13, %v729_v22 }
 0x822   : > { %1084 = shalt.err (!%p1081_p13)
}
 0x823   : > { %s1085_s4 = scalar_lea.hbm %s1385_s29, 128  ;;  %s1089_s5 = scalar_lea.hbm %s1432_s3, 256 }
 0x824   : > { %p1086_p4 = scmp.ne.s32.totalorder %s1385_s29, %s1085_s4  ;;  %p1090_p0 = scmp.lt.u32.totalorder %s1385_s29, %s1432_s3 }
 0x825   : > { %p1091_p3 = scmp.lt.u32.totalorder %s1089_s5, %s1085_s4  ;;  %p1093_p9 = scmp.lt.u32.totalorder %s1085_s4, %s1385_s29 }
 0x826   : > { %p1087_p2 = pnand %p1086_p4, %p1281_p7 }
 0x827   : > { %p1092_p5 = por %p1091_p3, %p1090_p0 }
 0x828   : > { %p1088_p11 = pneg %p1087_p2 }
 0x829   : > { %p1094_p12 = por %p1093_p9, %p1092_p5 }
 0x82b   : > { %p1095_p10 = pnand %p1094_p12, %p1088_p11 }
 0x82d   : > { %1098 = shalt.err (!%p1095_p10)
}
 0x82e   : > { %917 = dma.vmem_to_hbm [thread:$0]  (%p1281_p7), %s1387_s23, 128, %s1385_s29, %s733_s25  }
 0x82f PF: > { %s758_s9 = sand.u32 1, %s1133_s12   ;;  %p1449_p1 = scmp.ne.s32.totalorder %s1437_s19, 0 }
 0x830   : > { %p1450_p6 = scmp.ge.s32.totalorder %s1145_s15, 2  ;;  %s759_s17 = scalar_lea.sflag [#allocation4], %s758_s9 }
 0x832   : > { %p931_p8 = pnand %p1450_p6, %p1449_p1 }
 0x834   : > { %1128 = dma.done.wait (!%p931_p8), %s759_s17, 128  }
 0x835   : > { %1130 = vsyncadd (!%p931_p8), %s759_s17, 4294967168  ;;  %p18_p13 = scmp.ge.s32.totalorder %s1271_s22, 4   ;;  %s1451_s12 = smov %s1137_s13 }
 0x836   : > { %s1452_s13 = smov %s1141_s14  ;;  %s1453_s14 = smov %s1287_s27 }
 0x837   : > { %s1454_s15 = smov %s1271_s22  ;;  %20 = sbr.rel (!%p18_p13) target bundleno = 7 (0x7), region = 86 }
 0x83e   :  { %764 = vsyncpa [#allocation3], 1 }
 0x83f   :  { %766 = vsyncpa [#allocation3 + $0x1], 1 }
 0x840   :  { %767 = vsyncpa [#allocation7], 1 }
 0x841   :  { %768 = vsyncpa [#allocation4], 1 }
 0x842   :  { %770 = vsyncpa [#allocation4 + $0x1], 1 }
 0x843   :  { %771 = vsyncpa [#allocation5], 1 }
 0x844   :  { %773 = vsyncpa [#allocation5 + $0x1], 1 }

</bundles_post_ra>
